<compile_context>
chip_gen: v7x
topology: tpu7x:2x2x1
jax: 0.10.0
libtpu: 0.0.40
codegen_flags: <defaults>
</compile_context>

<pallas_src>
import functools

import jax
import jax.numpy as jnp
from jax.experimental import pallas as pl
from jax.experimental.pallas import tpu as pltpu


def _round_up(n, m):
    return ((n + m - 1) // m) * m


# ----------------------------- Pallas kernel ------------------------------ #

def dendritic_mlp_kernel(xc_ref,
                         wfused_ref, b1_ref,
                         w2_ref, b2_ref,
                         wout_ref, bout_ref,
                         out_ref, *, num_segments, hp1, hp2):
    # Single fused MXU dot: (TILE_B, in+C) @ (in+C, hp1 + K*hp1 + K*hp2).
    # Columns: [ ff1_pre_bias | dall1 (K*hp1) | dall2 (K*hp2) ].
    fused = jnp.dot(xc_ref[...], wfused_ref[...],
                    preferred_element_type=jnp.float32)

    k = num_segments
    ff1 = fused[:, 0:hp1] + b1_ref[...]
    dall1 = fused[:, hp1:hp1 + k * hp1]
    dall2 = fused[:, hp1 + k * hp1:hp1 + k * hp1 + k * hp2]

    def absmax_select(dall, hp):
        # Abs-max selection over the (small, static) segment axis on static
        # 128-lane-aligned slices.  Strict ">" keeps the FIRST index on ties,
        # matching torch.max semantics in dendritic_absolute_max_gate_1d.
        sel = dall[:, 0:hp]
        best_abs = jnp.abs(sel)
        for kk in range(1, num_segments):
            dk = dall[:, kk * hp:(kk + 1) * hp]
            ak = jnp.abs(dk)
            better = ak > best_abs
            best_abs = jnp.where(better, ak, best_abs)
            sel = jnp.where(better, dk, sel)
        return sel

    # Layer 1: relu(ff) * sigmoid(sel) == relu(ff * sigmoid(sel)) (sigmoid>0).
    sel1 = absmax_select(dall1, hp1)
    h1 = jnp.maximum(ff1, 0.0) * jax.nn.sigmoid(sel1)

    # Layer 2: its dendrites were already computed by the fused dot.
    ff2 = jnp.dot(h1.astype(jnp.bfloat16), w2_ref[...],
                  preferred_element_type=jnp.float32) + b2_ref[...]
    sel2 = absmax_select(dall2, hp2)
    h2 = jnp.maximum(ff2, 0.0) * jax.nn.sigmoid(sel2)

    # Classifier head; lane-dense bf16 store (halves output HBM traffic).
    out = jnp.dot(h2.astype(jnp.bfloat16), wout_ref[...],
                  preferred_element_type=jnp.float32) + bout_ref[...]
    out_ref[...] = out.astype(out_ref.dtype)


# ------------------------- host-side weight packing ------------------------ #

def prepare_params(params, lane=128):
    """Pad feature dims to lane multiples, fuse [W1 | segments-of-both-layers]
    into one block-diagonal matrix, cast matmul weights to bf16 (biases stay
    f32).  Zero padding is exactly neutral for this forward (padded units
    produce 0).  Host-side / one-time cost."""
    w1, b1, seg1, w2, b2, seg2, wout, bout = params
    in_size = w1.shape[0]
    dim_context = seg1.shape[1]
    h1, h2 = w1.shape[1], w2.shape[1]
    out_size = wout.shape[1]
    hp1, hp2 = _round_up(h1, lane), _round_up(h2, lane)
    out_pad = _round_up(out_size, lane)
    num_segments = seg1.shape[0]
    in_c = in_size + dim_context
    in_c_pad = _round_up(in_c, 16)          # bf16 sublane-friendly row count

    def pad2(a, rows, cols):
        return jnp.pad(a, ((0, rows - a.shape[0]), (0, cols - a.shape[1])))

    def pack_seg(seg, hp):
        k, c, h = seg.shape
        seg = jnp.pad(seg, ((0, 0), (0, 0), (0, hp - h)))          # (K, C, hp)
        return jnp.transpose(seg, (1, 0, 2)).reshape(c, k * hp)    # (C, K*hp)

    s1p = pack_seg(seg1, hp1)                                      # (C, K*hp1)
    s2p = pack_seg(seg2, hp2)                                      # (C, K*hp2)

    # Block-diagonal fused first-dot weight:
    #   rows [0, in_size)            : [ W1 | 0         | 0         ]
    #   rows [in_size, in_size + C)  : [ 0  | S1_packed | S2_packed ]
    n_fused = hp1 + num_segments * hp1 + num_segments * hp2
    w_fused = jnp.zeros((in_c_pad, n_fused), jnp.float32)
    w_fused = w_fused.at[:in_size, :hp1].set(pad2(w1, in_size, hp1))
    w_fused = w_fused.at[in_size:in_c, hp1:hp1 + num_segments * hp1].set(s1p)
    w_fused = w_fused.at[in_size:in_c, hp1 + num_segments * hp1:].set(s2p)

    bf = jnp.bfloat16
    packed = (
        w_fused.astype(bf),
        pad2(b1, 1, hp1),
        pad2(w2, hp1, hp2).astype(bf),
        pad2(b2, 1, hp2),
        pad2(wout, hp2, out_pad).astype(bf),
        pad2(bout, 1, out_pad),
    )
    meta = dict(num_segments=num_segments, hp1=hp1, hp2=hp2,
                out_pad=out_pad, out_size=out_size,
                in_size=in_size, dim_context=dim_context, in_c_pad=in_c_pad)
    return packed, meta


# --------------------------------- wrapper --------------------------------- #

def _choose_tile_b(batch, tile_b):
    """Batch-tile heuristic:
       * default 512: amortizes the ~0.35 us per-grid-step overhead and fills
         the 256-row MXU M dimension on v6e/v7x (v5e's 4x128x128 MXU is
         already full at 128 rows);
       * small-batch path: never pad a tiny batch up to a full tile;
       * v7x megacore: if the whole batch would land in a single tile but is
         large enough that each half still fills 256 MXU rows, split into two
         tiles so the "parallel" grid axis shards across both TensorCores."""
    tile_b = min(tile_b, _round_up(batch, 16))
    if batch >= 512 and _round_up(batch, tile_b) // tile_b == 1:
        tile_b = _round_up((batch + 1) // 2, 256)
    return tile_b


def dendritic_mlp_forward(x, context, packed, meta, *, tile_b=512):
    batch = x.shape[0]
    tile_b = _choose_tile_b(batch, tile_b)
    bp = _round_up(batch, tile_b)

    # One streamed input per grid step: [x | context] concatenated, bf16.
    xc = jnp.concatenate([x, context], axis=1).astype(jnp.bfloat16)
    xc = jnp.pad(xc, ((0, bp - batch), (0, meta["in_c_pad"] - xc.shape[1])))

    act_spec = pl.BlockSpec((tile_b, meta["in_c_pad"]), lambda i: (i, 0))

    def resident_spec(a):                  # constant index_map -> stays in VMEM
        return pl.BlockSpec(a.shape, lambda i: (0, 0))

    kernel = functools.partial(dendritic_mlp_kernel,
                               num_segments=meta["num_segments"],
                               hp1=meta["hp1"], hp2=meta["hp2"])

    out = pl.pallas_call(
        kernel,
        out_shape=jax.ShapeDtypeStruct((bp, meta["out_pad"]), jnp.bfloat16),
        grid=(bp // tile_b,),
        in_specs=[act_spec] + [resident_spec(a) for a in packed],
        out_specs=pl.BlockSpec((tile_b, meta["out_pad"]), lambda i: (i, 0)),
        compiler_params=pltpu.CompilerParams(
            dimension_semantics=("parallel",)),
    )(xc, *packed)

    return out[:batch, :meta["out_size"]].astype(jnp.float32)


# --------------------------- pure-JAX reference ---------------------------- #

def reference_forward(x, context, params):
    """Mirrors DendriticMLP.forward (AbsoluteMaxGating + ReLU, kw=False, single
    head) under the same mixed-precision policy as the kernel: bf16 matmul
    operands, f32 accumulation, f32 gating/activation math."""
    w1, b1, seg1, w2, b2, seg2, wout, bout = params
    bf = lambda a: a.astype(jnp.bfloat16)

    def layer(h, w, b, seg):
        ff = jnp.dot(bf(h), bf(w), preferred_element_type=jnp.float32) + b
        d = jnp.einsum("bc,kch->bkh", bf(context), bf(seg),
                       preferred_element_type=jnp.float32)       # (B, K, H)
        idx = jnp.argmax(jnp.abs(d), axis=1)                     # first-max index
        sel = jnp.take_along_axis(d, idx[:, None, :], axis=1)[:, 0, :]
        return jnp.maximum(ff * jax.nn.sigmoid(sel), 0.0)        # module's order

    h = layer(x, w1, b1, seg1)
    h = layer(h, w2, b2, seg2)
    return jnp.dot(bf(h), bf(wout), preferred_element_type=jnp.float32) + bout


# ---------------------- deterministic parameter init ----------------------- #

def _sparse_uniform(key, shape, bound, sparsity):
    """Uniform(-bound, bound) weights with a deterministic sparsity mask
    (emulates SparseWeights + rezero_weights)."""
    k_w, k_m = jax.random.split(key)
    w = jax.random.uniform(k_w, shape, jnp.float32, -bound, bound)
    mask = jax.random.uniform(k_m, shape, jnp.float32) >= sparsity
    return w * mask.astype(jnp.float32)


def init_params(key, input_size, hidden_sizes, num_segments, dim_context,
                output_size, weight_sparsity=0.95, dendrite_sparsity=0.95):
    params = []
    prev = input_size
    keys = jax.random.split(key, 3 * len(hidden_sizes) + 2)
    ki = 0
    for h in hidden_sizes:
        # "modified" Kaiming: bound = 1/sqrt(input_density*weight_density*fan_in)
        # (input_density == 1.0 here: first layer, and kw=False for later layers)
        w_bound = 1.0 / jnp.sqrt((1.0 - weight_sparsity) * prev)
        w = _sparse_uniform(keys[ki], (prev, h), w_bound, weight_sparsity); ki += 1
        b_bound = 1.0 / jnp.sqrt(prev)  # default nn.Linear bias init
        b = jax.random.uniform(keys[ki], (1, h), jnp.float32, -b_bound, b_bound); ki += 1
        d_bound = 1.0 / jnp.sqrt((1.0 - dendrite_sparsity) * dim_context)
        seg = _sparse_uniform(keys[ki], (num_segments, dim_context, h),
                              d_bound, dendrite_sparsity); ki += 1
        params.extend([w, b, seg])
        prev = h
    wo_bound = 1.0 / jnp.sqrt((1.0 - weight_sparsity) * prev)
    wout = _sparse_uniform(keys[ki], (prev, output_size), wo_bound, weight_sparsity); ki += 1
    bo_bound = 1.0 / jnp.sqrt(prev)
    bout = jax.random.uniform(keys[ki], (1, output_size), jnp.float32,
                              -bo_bound, bo_bound)
    params.extend([wout, bout])
    return tuple(params)


# ---------------------------------- main ----------------------------------- #

if __name__ == "__main__":
    INPUT_SIZE = 32
    HIDDEN_SIZES = (64, 64)
    NUM_SEGMENTS = 4
    DIM_CONTEXT = 32
    OUTPUT_SIZE = 16
    BATCH = 2

    root = jax.random.PRNGKey(0)
    k_p, k_x, k_c = jax.random.split(root, 3)

    params = init_params(k_p, INPUT_SIZE, HIDDEN_SIZES, NUM_SEGMENTS,
                         DIM_CONTEXT, OUTPUT_SIZE)
    x = jax.random.normal(k_x, (BATCH, INPUT_SIZE), jnp.float32)
    context = jax.random.normal(k_c, (BATCH, DIM_CONTEXT), jnp.float32)

    packed, meta = prepare_params(params)          # one-time host-side packing
    out = dendritic_mlp_forward(x, context, packed, meta)
    out = jax.block_until_ready(out)

    ref = reference_forward(x, context, params)
    assert out.shape == (BATCH, OUTPUT_SIZE)
    # Tolerance covers the bf16 output store on top of the shared
    # bf16-operand / f32-accumulate matmul policy.
    assert jnp.allclose(out, ref, atol=2e-2, rtol=2e-2), (out, ref)

    print("KERNEL_OK")
</pallas_src>

<mosaic_0001>
module attributes {stable_mosaic.version = 11 : i64} {
  func.func @dendritic_mlp_kernel(%arg0: i32, %arg1: memref<16x64xbf16, #tpu.memory_space<vmem>>, %arg2: memref<64x1152xbf16, #tpu.memory_space<vmem>>, %arg3: memref<1x128xf32, #tpu.memory_space<vmem>>, %arg4: memref<128x128xbf16, #tpu.memory_space<vmem>>, %arg5: memref<1x128xf32, #tpu.memory_space<vmem>>, %arg6: memref<128x128xbf16, #tpu.memory_space<vmem>>, %arg7: memref<1x128xf32, #tpu.memory_space<vmem>>, %arg8: memref<16x128xbf16, #tpu.memory_space<vmem>>) attributes {dimension_semantics = [#tpu.dimension_semantics<parallel>], iteration_bounds = array<i64: 1>, scalar_prefetch = 0 : i64, scratch_operands = 0 : i64, tpu.core_type = #tpu.core_type<tc>, window_params = [{transform_indices = @transform_0, window_bounds = array<i64: 16, 64>}, {pipeline_mode = #tpu.pipeline_mode<synchronous>, transform_indices = @transform_1, window_bounds = array<i64: 64, 1152>}, {pipeline_mode = #tpu.pipeline_mode<synchronous>, transform_indices = @transform_2, window_bounds = array<i64: 1, 128>}, {pipeline_mode = #tpu.pipeline_mode<synchronous>, transform_indices = @transform_3, window_bounds = array<i64: 128, 128>}, {pipeline_mode = #tpu.pipeline_mode<synchronous>, transform_indices = @transform_4, window_bounds = array<i64: 1, 128>}, {pipeline_mode = #tpu.pipeline_mode<synchronous>, transform_indices = @transform_5, window_bounds = array<i64: 128, 128>}, {pipeline_mode = #tpu.pipeline_mode<synchronous>, transform_indices = @transform_6, window_bounds = array<i64: 1, 128>}, {transform_indices = @transform_7, window_bounds = array<i64: 16, 128>}]} {
    %c0 = arith.constant 0 : index
    %c0_0 = arith.constant 0 : index
    %0 = vector.load %arg1[%c0, %c0_0] : memref<16x64xbf16, #tpu.memory_space<vmem>>, vector<16x64xbf16>
    %c0_1 = arith.constant 0 : index
    %c0_2 = arith.constant 0 : index
    %1 = vector.load %arg2[%c0_1, %c0_2] : memref<64x1152xbf16, #tpu.memory_space<vmem>>, vector<64x1152xbf16>
    %cst = arith.constant dense<0.000000e+00> : vector<16x1152xf32>
    %2 = tpu.matmul %0, %1, %cst {dimension_numbers = #tpu.dot_dimension_numbers<[1], [0], [0], [1], [0, 0, 1, 1], [], []>} : vector<16x64xbf16>, vector<64x1152xbf16>, vector<16x1152xf32> -> vector<16x1152xf32>
    %3 = vector.extract_strided_slice %2 {offsets = [0, 0], sizes = [16, 128], strides = [1, 1]} : vector<16x1152xf32> to vector<16x128xf32>
    %c0_3 = arith.constant 0 : index
    %c0_4 = arith.constant 0 : index
    %4 = vector.load %arg3[%c0_3, %c0_4] : memref<1x128xf32, #tpu.memory_space<vmem>>, vector<1x128xf32>
    %5 = vector.broadcast %4 : vector<1x128xf32> to vector<16x128xf32>
    %6 = arith.addf %3, %5 : vector<16x128xf32>
    %7 = vector.extract_strided_slice %2 {offsets = [0, 128], sizes = [16, 512], strides = [1, 1]} : vector<16x1152xf32> to vector<16x512xf32>
    %8 = vector.extract_strided_slice %2 {offsets = [0, 640], sizes = [16, 512], strides = [1, 1]} : vector<16x1152xf32> to vector<16x512xf32>
    %9 = vector.extract_strided_slice %7 {offsets = [0, 0], sizes = [16, 128], strides = [1, 1]} : vector<16x512xf32> to vector<16x128xf32>
    %10 = math.absf %9 : vector<16x128xf32>
    %11 = vector.extract_strided_slice %7 {offsets = [0, 128], sizes = [16, 128], strides = [1, 1]} : vector<16x512xf32> to vector<16x128xf32>
    %12 = math.absf %11 : vector<16x128xf32>
    %13 = arith.cmpf ogt, %12, %10 : vector<16x128xf32>
    %14 = arith.select %13, %12, %10 : vector<16x128xi1>, vector<16x128xf32>
    %15 = arith.select %13, %11, %9 : vector<16x128xi1>, vector<16x128xf32>
    %16 = vector.extract_strided_slice %7 {offsets = [0, 256], sizes = [16, 128], strides = [1, 1]} : vector<16x512xf32> to vector<16x128xf32>
    %17 = math.absf %16 : vector<16x128xf32>
    %18 = arith.cmpf ogt, %17, %14 : vector<16x128xf32>
    %19 = arith.select %18, %17, %14 : vector<16x128xi1>, vector<16x128xf32>
    %20 = arith.select %18, %16, %15 : vector<16x128xi1>, vector<16x128xf32>
    %21 = vector.extract_strided_slice %7 {offsets = [0, 384], sizes = [16, 128], strides = [1, 1]} : vector<16x512xf32> to vector<16x128xf32>
    %22 = math.absf %21 : vector<16x128xf32>
    %23 = arith.cmpf ogt, %22, %19 : vector<16x128xf32>
    %24 = arith.select %23, %21, %20 : vector<16x128xi1>, vector<16x128xf32>
    %cst_5 = arith.constant 0.000000e+00 : f32
    %25 = vector.broadcast %cst_5 : f32 to vector<16x128xf32>
    %26 = arith.maximumf %6, %25 : vector<16x128xf32>
    %27 = arith.negf %24 : vector<16x128xf32>
    %28 = math.exp %27 : vector<16x128xf32>
    %cst_6 = arith.constant 1.000000e+00 : f32
    %29 = vector.broadcast %cst_6 : f32 to vector<16x128xf32>
    %30 = arith.addf %29, %28 : vector<16x128xf32>
    %31 = arith.divf %29, %30 : vector<16x128xf32>
    %32 = arith.mulf %26, %31 : vector<16x128xf32>
    %33 = arith.truncf %32 : vector<16x128xf32> to vector<16x128xbf16>
    %c0_7 = arith.constant 0 : index
    %c0_8 = arith.constant 0 : index
    %34 = vector.load %arg4[%c0_7, %c0_8] : memref<128x128xbf16, #tpu.memory_space<vmem>>, vector<128x128xbf16>
    %cst_9 = arith.constant dense<0.000000e+00> : vector<16x128xf32>
    %35 = tpu.matmul %33, %34, %cst_9 {dimension_numbers = #tpu.dot_dimension_numbers<[1], [0], [0], [1], [0, 0, 1, 1], [], []>} : vector<16x128xbf16>, vector<128x128xbf16>, vector<16x128xf32> -> vector<16x128xf32>
    %c0_10 = arith.constant 0 : index
    %c0_11 = arith.constant 0 : index
    %36 = vector.load %arg5[%c0_10, %c0_11] : memref<1x128xf32, #tpu.memory_space<vmem>>, vector<1x128xf32>
    %37 = vector.broadcast %36 : vector<1x128xf32> to vector<16x128xf32>
    %38 = arith.addf %35, %37 : vector<16x128xf32>
    %39 = vector.extract_strided_slice %8 {offsets = [0, 0], sizes = [16, 128], strides = [1, 1]} : vector<16x512xf32> to vector<16x128xf32>
    %40 = math.absf %39 : vector<16x128xf32>
    %41 = vector.extract_strided_slice %8 {offsets = [0, 128], sizes = [16, 128], strides = [1, 1]} : vector<16x512xf32> to vector<16x128xf32>
    %42 = math.absf %41 : vector<16x128xf32>
    %43 = arith.cmpf ogt, %42, %40 : vector<16x128xf32>
    %44 = arith.select %43, %42, %40 : vector<16x128xi1>, vector<16x128xf32>
    %45 = arith.select %43, %41, %39 : vector<16x128xi1>, vector<16x128xf32>
    %46 = vector.extract_strided_slice %8 {offsets = [0, 256], sizes = [16, 128], strides = [1, 1]} : vector<16x512xf32> to vector<16x128xf32>
    %47 = math.absf %46 : vector<16x128xf32>
    %48 = arith.cmpf ogt, %47, %44 : vector<16x128xf32>
    %49 = arith.select %48, %47, %44 : vector<16x128xi1>, vector<16x128xf32>
    %50 = arith.select %48, %46, %45 : vector<16x128xi1>, vector<16x128xf32>
    %51 = vector.extract_strided_slice %8 {offsets = [0, 384], sizes = [16, 128], strides = [1, 1]} : vector<16x512xf32> to vector<16x128xf32>
    %52 = math.absf %51 : vector<16x128xf32>
    %53 = arith.cmpf ogt, %52, %49 : vector<16x128xf32>
    %54 = arith.select %53, %51, %50 : vector<16x128xi1>, vector<16x128xf32>
    %cst_12 = arith.constant 0.000000e+00 : f32
    %55 = vector.broadcast %cst_12 : f32 to vector<16x128xf32>
    %56 = arith.maximumf %38, %55 : vector<16x128xf32>
    %57 = arith.negf %54 : vector<16x128xf32>
    %58 = math.exp %57 : vector<16x128xf32>
    %cst_13 = arith.constant 1.000000e+00 : f32
    %59 = vector.broadcast %cst_13 : f32 to vector<16x128xf32>
    %60 = arith.addf %59, %58 : vector<16x128xf32>
    %61 = arith.divf %59, %60 : vector<16x128xf32>
    %62 = arith.mulf %56, %61 : vector<16x128xf32>
    %63 = arith.truncf %62 : vector<16x128xf32> to vector<16x128xbf16>
    %c0_14 = arith.constant 0 : index
    %c0_15 = arith.constant 0 : index
    %64 = vector.load %arg6[%c0_14, %c0_15] : memref<128x128xbf16, #tpu.memory_space<vmem>>, vector<128x128xbf16>
    %cst_16 = arith.constant dense<0.000000e+00> : vector<16x128xf32>
    %65 = tpu.matmul %63, %64, %cst_16 {dimension_numbers = #tpu.dot_dimension_numbers<[1], [0], [0], [1], [0, 0, 1, 1], [], []>} : vector<16x128xbf16>, vector<128x128xbf16>, vector<16x128xf32> -> vector<16x128xf32>
    %c0_17 = arith.constant 0 : index
    %c0_18 = arith.constant 0 : index
    %66 = vector.load %arg7[%c0_17, %c0_18] : memref<1x128xf32, #tpu.memory_space<vmem>>, vector<1x128xf32>
    %67 = vector.broadcast %66 : vector<1x128xf32> to vector<16x128xf32>
    %68 = arith.addf %65, %67 : vector<16x128xf32>
    %69 = arith.truncf %68 : vector<16x128xf32> to vector<16x128xbf16>
    %c0_19 = arith.constant 0 : index
    %c0_20 = arith.constant 0 : index
    %70 = vector.load %arg8[%c0_19, %c0_20] : memref<16x128xbf16, #tpu.memory_space<vmem>>, vector<16x128xbf16>
    tpu.vector_store %arg8[%c0_19, %c0_20], %69 {strides = array<i32>} : memref<16x128xbf16, #tpu.memory_space<vmem>>, vector<16x128xbf16>,
    return
  }
  func.func @transform_0(%arg0: i32) -> (i32, i32) {
    %c0_i32 = arith.constant 0 : i32
    %c0_i32_0 = arith.constant 0 : i32
    return %arg0, %c0_i32 : i32, i32
  }
  func.func @transform_1(%arg0: i32) -> (i32, i32) {
    %c0_i32 = arith.constant 0 : i32
    %c0_i32_0 = arith.constant 0 : i32
    %c0_i32_1 = arith.constant 0 : i32
    return %c0_i32, %c0_i32_0 : i32, i32
  }
  func.func @transform_2(%arg0: i32) -> (i32, i32) {
    %c0_i32 = arith.constant 0 : i32
    %c0_i32_0 = arith.constant 0 : i32
    %c0_i32_1 = arith.constant 0 : i32
    return %c0_i32, %c0_i32_0 : i32, i32
  }
  func.func @transform_3(%arg0: i32) -> (i32, i32) {
    %c0_i32 = arith.constant 0 : i32
    %c0_i32_0 = arith.constant 0 : i32
    %c0_i32_1 = arith.constant 0 : i32
    return %c0_i32, %c0_i32_0 : i32, i32
  }
  func.func @transform_4(%arg0: i32) -> (i32, i32) {
    %c0_i32 = arith.constant 0 : i32
    %c0_i32_0 = arith.constant 0 : i32
    %c0_i32_1 = arith.constant 0 : i32
    return %c0_i32, %c0_i32_0 : i32, i32
  }
  func.func @transform_5(%arg0: i32) -> (i32, i32) {
    %c0_i32 = arith.constant 0 : i32
    %c0_i32_0 = arith.constant 0 : i32
    %c0_i32_1 = arith.constant 0 : i32
    return %c0_i32, %c0_i32_0 : i32, i32
  }
  func.func @transform_6(%arg0: i32) -> (i32, i32) {
    %c0_i32 = arith.constant 0 : i32
    %c0_i32_0 = arith.constant 0 : i32
    %c0_i32_1 = arith.constant 0 : i32
    return %c0_i32, %c0_i32_0 : i32, i32
  }
  func.func @transform_7(%arg0: i32) -> (i32, i32) {
    %c0_i32 = arith.constant 0 : i32
    %c0_i32_0 = arith.constant 0 : i32
    return %arg0, %c0_i32 : i32, i32
  }
}

</mosaic_0001>

<bundles_post_ra>
// kernel: tpu_custom_call.1
= control target key start
LH: loop header
LB: loop body
LE: loop exit
PB: predicated region body
PF: predicated region fallthrough
CT: control target
= control target key end

     0   :  { %12 = vsyncpa [#allocation3], 0  ;;  %s1425_s0 = inlined_call_operand.hbm [shape: bf16[16,64], index: 0, kind: input, shape index: {}]   ;;  %s1426_s1 = inlined_call_operand.hbm [shape: bf16[64,1152], index: 1, kind: input, shape index: {}]   ;;  %s1427_s2 = inlined_call_operand.vmem [shape: f32[1,128], index: 2, kind: input, shape index: {}]   ;;  %s1428_s3 = inlined_call_operand.hbm [shape: bf16[128,128], index: 3, kind: input, shape index: {}]   ;;  %s1429_s4 = inlined_call_operand.vmem [shape: f32[1,128], index: 4, kind: input, shape index: {}]   ;;  %s1430_s5 = inlined_call_operand.hbm [shape: bf16[128,128], index: 5, kind: input, shape index: {}]   ;;  %s1431_s6 = inlined_call_operand.vmem [shape: f32[1,128], index: 6, kind: input, shape index: {}]   ;;  %s1432_s7 = inlined_call_operand.hbm [shape: bf16[16,128], index: 7, kind: output, shape index: {}]  }
   0x1   :  { %13 = vsyncpa [#allocation6], 0 }
   0x2   :  { %14 = vsyncpa [#allocation9], 0 }
   0x3   :  { %15 = vsyncpa [#allocation4], 0  ;;  %s1239_s24 = smov [#allocation5]   ;;  %s1121_s28 = scalar_lea.hbm %s1426_s1, 4608 }
   0x4   :  { %s33_s25 = sshll.u32 %s1239_s24, 4  ;;  %p1122_p0 = scmp.ne.s32.totalorder %s1426_s1, %s1121_s28  ;;  %s34_s25 = int_to_ptr.vmem [resolvable:$true] %s33_s25 }
   0x5   :  { %p1125_p1 = scmp.lt.u32.totalorder %s1121_s28, %s1426_s1 }
   0x7   :  { %p1127_p2 = pnand %p1125_p1, %p1122_p0 }
   0x9   :  { %1130 = shalt.err (!%p1127_p2)
}
   0xa   :  { %s1131_s10 = scalar_lea.vmem %s34_s25, 4608  ;;  %p1136_p4 = scmp.lt.s32.totalorder %s34_s25, %s34_s25 }
   0xb   :  { %p1132_p3 = scmp.ne.s32.totalorder %s34_s25, %s1131_s10  ;;  %p1137_p5 = scmp.lt.s32.totalorder %s1131_s10, %s1131_s10 }
   0xd   :  { %p1138_p6 = por %p1137_p5, %p1136_p4 }
   0xf   :  { %p1139_p7 = pnand %p1138_p6, %p1132_p3 }
  0x11   :  { %1142 = shalt.err (!%p1139_p7)
}
  0x12   :  { %s1240_s11 = smov 576   ;;  %s1241_s12 = smov 36  }
  0x13   :  { %39 = dma.hbm_to_vmem [thread:$0]  %s1426_s1, 4608, %s34_s25, [#allocation6], %s1240_s11, %s1240_s11, %s1241_s12  }
  0x14   :  { %s1242_s15 = smov [#allocation2]   ;;  %s1143_s19 = scalar_lea.hbm %s1425_s0, 128 }
  0x15   :  { %s21_s16 = sshll.u32 %s1242_s15, 4  ;;  %p1144_p8 = scmp.ne.s32.totalorder %s1425_s0, %s1143_s19  ;;  %s22_s16 = int_to_ptr.vmem [resolvable:$true] %s21_s16 }
  0x16   :  { %p1147_p9 = scmp.lt.u32.totalorder %s1143_s19, %s1425_s0 }
  0x18   :  { %p1149_p10 = pnand %p1147_p9, %p1144_p8 }
  0x1a   :  { %1152 = shalt.err (!%p1149_p10)
}
  0x1b   :  { %s1153_s24 = scalar_lea.vmem %s22_s16, 128  ;;  %p1158_p12 = scmp.lt.s32.totalorder %s22_s16, %s22_s16 }
  0x1c   :  { %p1154_p11 = scmp.ne.s32.totalorder %s22_s16, %s1153_s24  ;;  %p1159_p13 = scmp.lt.s32.totalorder %s1153_s24, %s1153_s24 }
  0x1e   :  { %p1160_p0 = por %p1159_p13, %p1158_p12 }
  0x20   :  { %p1161_p1 = pnand %p1160_p0, %p1154_p11 }
  0x22   :  { %1164 = shalt.err (!%p1161_p1)
}
  0x23   :  { %s1243_s1 = smov 64   ;;  %s1244_s25 = smov 4  }
  0x24   :  { %27 = dma.hbm_to_vmem [thread:$0]  %s1425_s0, 128, %s22_s16, [#allocation3], %s1243_s1, %s1243_s1, %s1244_s25  }
  0x25   :  { %s1245_s28 = smov [#allocation7]   ;;  %s1246_s30 = smov [#allocation8]  }
  0x26   :  { %s47_s29 = sshll.u32 %s1245_s28, 4  ;;  %s61_s8 = sshll.u32 %s1246_s30, 4  ;;  %s48_s29 = int_to_ptr.vmem [resolvable:$true] %s47_s29  ;;  %s1318_s8 = int_to_ptr.vmem [resolvable:$true] %s61_s8 }
  0x27   :  { %s1165_s11 = scalar_lea.hbm %s1428_s3, 1024 }
  0x28   :  { %p1166_p2 = scmp.ne.s32.totalorder %s1428_s3, %s1165_s11  ;;  %p1169_p3 = scmp.lt.u32.totalorder %s1165_s11, %s1428_s3 }
  0x2a   :  { %p1171_p4 = pnand %p1169_p3, %p1166_p2 }
  0x2c   :  { %1174 = shalt.err (!%p1171_p4)
}
  0x2d   :  { %s1175_s0 = scalar_lea.vmem %s48_s29, 1024  ;;  %p1180_p6 = scmp.lt.s32.totalorder %s48_s29, %s48_s29 }
  0x2e   :  { %p1176_p5 = scmp.ne.s32.totalorder %s48_s29, %s1175_s0  ;;  %p1181_p7 = scmp.lt.s32.totalorder %s1175_s0, %s1175_s0 }
  0x30   :  { %p1182_p8 = por %p1181_p7, %p1180_p6 }
  0x32   :  { %p1183_p9 = pnand %p1182_p8, %p1176_p5 }
  0x34   :  { %1186 = shalt.err (!%p1183_p9)
}
  0x35   :  { %53 = dma.hbm_to_vmem [thread:$0]  %s1428_s3, 1024, %s48_s29, [#allocation6], %s1243_s1, %s1243_s1, %s1244_s25  }
  0x36   :  { %s1187_s20 = scalar_lea.hbm %s1430_s5, 1024 }
  0x37   :  { %p1188_p10 = scmp.ne.s32.totalorder %s1430_s5, %s1187_s20  ;;  %p1191_p11 = scmp.lt.u32.totalorder %s1187_s20, %s1430_s5 }
  0x39   :  { %p1193_p12 = pnand %p1191_p11, %p1188_p10 }
  0x3b   :  { %1196 = shalt.err (!%p1193_p12)
}
  0x3c   :  { %s1197_s26 = scalar_lea.vmem %s1318_s8, 1024  ;;  %p1202_p0 = scmp.lt.s32.totalorder %s1318_s8, %s1318_s8 }
  0x3d   :  { %p1198_p13 = scmp.ne.s32.totalorder %s1318_s8, %s1197_s26  ;;  %p1203_p1 = scmp.lt.s32.totalorder %s1197_s26, %s1197_s26 }
  0x3f   :  { %p1204_p2 = por %p1203_p1, %p1202_p0 }
  0x41   :  { %p1205_p3 = pnand %p1204_p2, %p1198_p13 }
  0x43   :  { %1208 = shalt.err (!%p1205_p3)
}
  0x44   :  { %67 = dma.hbm_to_vmem [thread:$0]  %s1430_s5, 1024, %s1318_s8, [#allocation9], %s1243_s1, %s1243_s1, %s1244_s25  }
  0x45   :  { %1231 = dma.done.wait [#allocation3], 128  }
  0x46   :  { %1232 = vsyncadd [#allocation3], 4294967168 }
  0x47   :  { %1233 = dma.done.wait [#allocation6], 5632  }
  0x48   :  { %1234 = vsyncadd [#allocation6], 4294961664 }
  0x49   :  { %1235 = dma.done.wait [#allocation9], 1024  }
  0x4a   :  { %1236 = vsyncadd [#allocation9], 4294966272  ;;  %v1247_v0 = vmov 0   ;;  %v1036_v1 = vld [vmem:[#allocation5 + $0x4] ss:$36 sps:$4 sm:$0xff]   ;;  %v1060_v18 = vld [vmem:[#allocation2] sm:$0xff]  }
  0x4b   :  { %350 = vmatprep.mubr.bf16.mxu0 %v1247_v0  ;;  %393 = vmatprep.mubr.bf16.mxu1 %v1247_v0  ;;  %v1038_v2 = vld [vmem:[#allocation5] ss:$36 sps:$4 sm:$0xff]   ;;  %v1039_v3 = vld [vmem:[#allocation5 + $0xc] ss:$36 sps:$4 sm:$0xff]   ;;  %v1045_v7 = vld [vmem:[#allocation5 + $0x54] ss:$36 sps:$4 sm:$0xff]  }
  0x4c   :  { %318 = vmatprep.subr.bf16.mxu0 %v1036_v1  ;;  %v1041_v4 = vld [vmem:[#allocation5 + $0x8] ss:$36 sps:$4 sm:$0xff]   ;;  %361 = vmatprep.subr.bf16.mxu1 %v1039_v3  ;;  %v1047_v8 = vld [vmem:[#allocation5 + $0x50] ss:$36 sps:$4 sm:$0xff]   ;;  %v1051_v11 = vld [vmem:[#allocation5 + $0x9c] ss:$36 sps:$4 sm:$0xff]  }
  0x4d   :  { %319 = vmatpush1.bf16.msra.mxu0 %v1038_v2  ;;  %v1042_v5 = vld [vmem:[#allocation5 + $0x4c] ss:$36 sps:$4 sm:$0xff]   ;;  %362 = vmatpush1.bf16.msra.mxu1 %v1041_v4  ;;  %v1048_v9 = vld [vmem:[#allocation5 + $0x94] ss:$36 sps:$4 sm:$0xff]   ;;  %v1054_v12 = vld [vmem:[#allocation5 + $0xdc] ss:$36 sps:$4 sm:$0xff]  }
  0x4e   :  { %v1044_v6 = vld [vmem:[#allocation5 + $0x48] ss:$36 sps:$4 sm:$0xff]   ;;  %320 = vmatprep.subr.bf16.mxu0 %v1042_v5  ;;  %363 = vmatprep.subr.bf16.mxu1 %v1045_v7  ;;  %v1050_v10 = vld [vmem:[#allocation5 + $0x90] ss:$36 sps:$4 sm:$0xff]   ;;  %v1053_v13 = vld [vmem:[#allocation5 + $0x98] ss:$36 sps:$4 sm:$0xff]  }
  0x4f   :  { %v1057_v14 = vld [vmem:[#allocation5 + $0xe4] ss:$36 sps:$4 sm:$0xff]   ;;  %v1056_v15 = vld [vmem:[#allocation5 + $0xd8] ss:$36 sps:$4 sm:$0xff]   ;;  %vm314_vm0 = vcmask 523264   ;;  %v1248_v35 = vmov 0.0  }
  0x50   :  { %v1059_v16 = vld [vmem:[#allocation5 + $0xe0] ss:$36 sps:$4 sm:$0xff]   ;;  %v1063_v17 = vld [vmem:[#allocation5 + $0x14] ss:$36 sps:$4 sm:$0xff]   ;;  %v1078_v28 = vld [vmem:[#allocation5 + $0xac] ss:$36 sps:$4 sm:$0xff]  }
  0x51   :  { %321 = vmatpush1.bf16.msra.mxu0 %v1044_v6  ;;  %364 = vmatpush1.bf16.msra.mxu1 %v1047_v8  ;;  %v1066_v19 = vld [vmem:[#allocation5 + $0x1c] ss:$36 sps:$4 sm:$0xff]   ;;  %v1061_v20 = vld [vmem:[#allocation5 + $0x10] ss:$36 sps:$4 sm:$0xff]   ;;  %v1072_v23 = vld [vmem:[#allocation5 + $0x64] ss:$36 sps:$4 sm:$0xff]  }
  0x52   :  { %322 = vmatprep.subr.bf16.mxu0 %v1048_v9  ;;  %365 = vmatprep.subr.bf16.mxu1 %v1051_v11  ;;  %v1069_v21 = vld [vmem:[#allocation5 + $0x5c] ss:$36 sps:$4 sm:$0xff]   ;;  %v1075_v26 = vld [vmem:[#allocation5 + $0xa4] ss:$36 sps:$4 sm:$0xff]   ;;  %v1081_v30 = vld [vmem:[#allocation5 + $0xec] ss:$36 sps:$4 sm:$0xff]  }
  0x53   :  { %v1064_v22 = vld [vmem:[#allocation5 + $0x18] ss:$36 sps:$4 sm:$0xff]   ;;  %v1070_v25 = vld [vmem:[#allocation5 + $0x60] ss:$36 sps:$4 sm:$0xff]   ;;  %v1076_v29 = vld [vmem:[#allocation5 + $0xa8] ss:$36 sps:$4 sm:$0xff]  }
  0x54   :  { %v1067_v24 = vld [vmem:[#allocation5 + $0x58] ss:$36 sps:$4 sm:$0xff]   ;;  %v1073_v27 = vld [vmem:[#allocation5 + $0xa0] ss:$36 sps:$4 sm:$0xff]   ;;  %v1079_v31 = vld [vmem:[#allocation5 + $0xe8] ss:$36 sps:$4 sm:$0xff]  }
  0x55   :  { %323 = vmatpush1.bf16.msra.mxu0 %v1050_v10  ;;  %366 = vmatpush1.bf16.msra.mxu1 %v1053_v13  ;;  %v1084_v32 = vld [vmem:[#allocation5 + $0xf4] ss:$36 sps:$4 sm:$0xff]   ;;  %v1085_v34 = vld [vmem:[#allocation5 + $0x20] ss:$36 sps:$4 sm:$0xff]   ;;  %v1086_v36 = vld [vmem:[#allocation5 + $0x68] ss:$36 sps:$4 sm:$0xff]  }
  0x56   :  { %324 = vmatprep.subr.bf16.mxu0 %v1054_v12  ;;  %367 = vmatprep.subr.bf16.mxu1 %v1057_v14  ;;  %v1082_v33 = vld [vmem:[#allocation5 + $0xf0] ss:$36 sps:$4 sm:$0xff]   ;;  %vm1249_vm1 = vmmov 0   ;;  %v1088_v38 = vld [vmem:[#allocation5 + $0xf8] ss:$36 sps:$4 sm:$0xff]   ;;  %v1089_v39 = vld [vmem:[#allocation7] sm:$0xff]  }
  0x57   :  { %v1087_v37 = vld [vmem:[#allocation5 + $0xb0] ss:$36 sps:$4 sm:$0xff]   ;;  %v1090_v40 = vld [vmem:[#allocation7 + $0x8] sm:$0xff]   ;;  %v1092_v42 = vld [vmem:[#allocation7 + $0x18] sm:$0xff]  }
  0x58   :  { %v1091_v41 = vld [vmem:[#allocation7 + $0x10] sm:$0xff]   ;;  %v1093_v43 = vld [vmem:[#allocation7 + $0x20] sm:$0xff]   ;;  %v1094_v44 = vld [vmem:[#allocation7 + $0x28] sm:$0xff]  }
  0x59   :  { %325 = vmatpush1.bf16.msra.mxu0 %v1056_v15  ;;  %368 = vmatpush1.bf16.msra.mxu1 %v1059_v16  ;;  %v1095_v45 = vld [vmem:[#allocation7 + $0x30] sm:$0xff]   ;;  %v1096_v46 = vld [vmem:[#allocation7 + $0x38] sm:$0xff]   ;;  %v1097_v47 = vld [vmem:[#allocation8] sm:$0xff]  }
  0x5a   :  { %404 = vmatprep.subr.bf16.mxu0 %v1063_v17  ;;  %447 = vmatprep.subr.bf16.mxu1 %v1066_v19  ;;  %v1098_v48 = vld [vmem:[#allocation8 + $0x8] sm:$0xff]   ;;  %v1099_v49 = vld [vmem:[#allocation8 + $0x10] sm:$0xff]   ;;  %v1100_v50 = vld [vmem:[#allocation8 + $0x18] sm:$0xff]  }
  0x5b   :  { %v1101_v51 = vld [vmem:[#allocation8 + $0x20] sm:$0xff]  }
  0x5c   :  { %912 = vmatmul.mubr.msk.bf16.vlgmr.msra.gmra.mrb[0].mxu0 %vm314_vm0, %v1060_v18  ;;  %913 = vmatmul.mubr.msk.bf16.vlgmr.msra.gmra.mrb[0].mxu1 %vm314_vm0, %v1060_v18 }
  0x5d   :  { %405 = vmatpush1.bf16.msra.mxu0 %v1061_v20  ;;  %436 = vmatprep.mubr.bf16.mxu0 %v1247_v0 }
  0x5e   :  { %406 = vmatprep.subr.bf16.mxu0 %v1069_v21  ;;  %448 = vmatpush1.bf16.msra.mxu1 %v1064_v22 }
  0x5f   :  { %479 = vmatprep.mubr.bf16.mxu1 %v1247_v0  ;;  %449 = vmatprep.subr.bf16.mxu1 %v1072_v23 }
  0x61   :  { %407 = vmatpush1.bf16.msra.mxu0 %v1067_v24 }
  0x62   :  { %408 = vmatprep.subr.bf16.mxu0 %v1075_v26  ;;  %450 = vmatpush1.bf16.msra.mxu1 %v1070_v25 }
  0x63   :  { %451 = vmatprep.subr.bf16.mxu1 %v1078_v28 }
  0x65   :  { %409 = vmatpush1.bf16.msra.mxu0 %v1073_v27 }
  0x66   :  { %410 = vmatprep.subr.bf16.mxu0 %v1081_v30  ;;  %452 = vmatpush1.bf16.msra.mxu1 %v1076_v29 }
  0x67   :  { %453 = vmatprep.subr.bf16.mxu1 %v1084_v32 }
  0x69   :  { %411 = vmatpush1.bf16.msra.mxu0 %v1079_v31 }
  0x6a   :  { %972 = vmatprep.subr.bf16.mxu0 %v1248_v35  ;;  %454 = vmatpush1.bf16.msra.mxu1 %v1082_v33 }
  0x6b   :  { %984 = vmatprep.subr.bf16.mxu1 %v1248_v35 }
  0x6c   :  { %914 = vmatmul.mubr.msk.bf16.vlgmr.msra.gmra.mrb[4].mxu0 %vm314_vm0, %v1060_v18 }
  0x6d   :  { %973 = vmatpush3.bf16.msra.mxu0 %v1085_v34  ;;  %980 = vmatprep.mubr.msk.bf16.mxu0 %vm1249_vm1, %v1248_v35 }
  0x6e   :  { %915 = vmatmul.mubr.msk.bf16.vlgmr.msra.gmra.mrb[4].mxu1 %vm314_vm0, %v1060_v18  ;;  %974 = vmatprep.subr.bf16.mxu0 %v1248_v35 }
  0x6f   :  { %1000 = vmatprep.mubr.msk.bf16.mxu1 %vm1249_vm1, %v1248_v35  ;;  %985 = vmatpush3.bf16.msra.mxu1 %v1089_v39 }
  0x70   :  { %986 = vmatprep.subr.bf16.mxu1 %v1248_v35 }
  0x71   :  { %975 = vmatpush3.bf16.msra.mxu0 %v1086_v36 }
  0x72   :  { %976 = vmatprep.subr.bf16.mxu0 %v1248_v35 }
  0x73   :  { %987 = vmatpush3.bf16.msra.mxu1 %v1090_v40 }
  0x74   :  { %988 = vmatprep.subr.bf16.mxu1 %v1248_v35 }
  0x75   :  { %977 = vmatpush3.bf16.msra.mxu0 %v1087_v37 }
  0x76   :  { %978 = vmatprep.subr.bf16.mxu0 %v1248_v35 }
  0x77   :  { %989 = vmatpush3.bf16.msra.mxu1 %v1091_v41 }
  0x78   :  { %990 = vmatprep.subr.bf16.mxu1 %v1248_v35 }
  0x79   :  { %979 = vmatpush3.bf16.msra.mxu0 %v1088_v38 }
  0x7a   :  { %1004 = vmatprep.subr.bf16.mxu0 %v1248_v35 }
  0x7b   :  { %991 = vmatpush3.bf16.msra.mxu1 %v1092_v42 }
  0x7c   :  { %981 = vmatmul.mubr.msk.bf16.vlgmr.msra.gmra.mrb[8].mxu0 %vm314_vm0, %v1060_v18  ;;  %992 = vmatprep.subr.bf16.mxu1 %v1248_v35 }
  0x7d   :  { %1020 = vmatprep.mubr.msk.bf16.mxu0 %vm1249_vm1, %v1248_v35  ;;  %1005 = vmatpush3.bf16.msra.mxu0 %v1097_v47 }
  0x7e   :  { %1006 = vmatprep.subr.bf16.mxu0 %v1248_v35 }
  0x7f   :  { %993 = vmatpush3.bf16.msra.mxu1 %v1093_v43 }
  0x80   :  { %994 = vmatprep.subr.bf16.mxu1 %v1248_v35 }
  0x81   :  { %1007 = vmatpush3.bf16.msra.mxu0 %v1098_v48 }
  0x82   :  { %1008 = vmatprep.subr.bf16.mxu0 %v1248_v35 }
  0x83   :  { %995 = vmatpush3.bf16.msra.mxu1 %v1094_v44 }
  0x84   :  { %996 = vmatprep.subr.bf16.mxu1 %v1248_v35 }
  0x85   :  { %1009 = vmatpush3.bf16.msra.mxu0 %v1099_v49 }
  0x86   :  { %1010 = vmatprep.subr.bf16.mxu0 %v1248_v35 }
  0x87   :  { %997 = vmatpush3.bf16.msra.mxu1 %v1095_v45 }
  0x88   :  { %998 = vmatprep.subr.bf16.mxu1 %v1248_v35 }
  0x89   :  { %1011 = vmatpush3.bf16.msra.mxu0 %v1100_v50 }
  0x8a   :  { %1012 = vmatprep.subr.bf16.mxu0 %v1248_v35 }
  0x8b   :  { %999 = vmatpush3.bf16.msra.mxu1 %v1096_v46 }
  0x8d   :  { %1013 = vmatpush3.bf16.msra.mxu0 %v1101_v51 }
  0x8e   :  { %1014 = vmatprep.subr.bf16.mxu0 %v1248_v35 }
 0x12f   :  { %v1381_v52 = vpop.f32.mrb[0].mxu0  ;;  %v395_v55 = vpop.f32.mrb[0].mxu1 }
 0x130   :  { %v354_v53 = vpop.f32.mrb[1].mxu0  ;;  %v542_v57 = vand.u32 2147483647, %v395_v55  ;;  %v397_v58 = vpop.f32.mrb[1].mxu1 }
 0x131   :  { %v540_v54 = vand.u32 2147483647, %v354_v53  ;;  %v1383_v56 = vpop.f32.mrb[2].mxu0  ;;  %v550_v60 = vand.u32 2147483647, %v397_v58  ;;  %v399_v62 = vpop.f32.mrb[2].mxu1 }
 0x132   :  { %v358_v59 = vpop.f32.mrb[3].mxu0  ;;  %v543_v63 = vand.u32 2147483647, %v399_v62  ;;  %v401_v0 = vpop.f32.mrb[3].mxu1 }
 0x133   :  { %v541_v61 = vand.u32 2147483647, %v358_v59  ;;  %vm544_vm2 = vcmp.gt.f32.partialorder %v542_v57, %v540_v54  ;;  %v551_v3 = vand.u32 2147483647, %v401_v0 }
 0x134   :  { %v548_v1 = vsel %vm544_vm2, %v395_v55, %v354_v53  ;;  %v546_v2 = vsel %vm544_vm2, %v542_v57, %v540_v54  ;;  %v917_v53 = vld [vmem:[%s1427_s2] ss:$0 sm:$0xff] }
 0x135   :  { %vm552_vm3 = vcmp.gt.f32.partialorder %v550_v60, %v546_v2  ;;  %vm545_vm4 = vcmp.gt.f32.partialorder %v543_v63, %v541_v61  ;;  %v538_v55 = vadd.f32 %v917_v53, %v1381_v52  ;;  %v539_v57 = vadd.f32 %v917_v53, %v1383_v56 }
 0x136   :  { %v556_v4 = vsel %vm552_vm3, %v397_v58, %v548_v1  ;;  %v549_v5 = vsel %vm545_vm4, %v399_v62, %v358_v59  ;;  %v547_v6 = vsel %vm545_vm4, %v543_v63, %v541_v61  ;;  %v554_v7 = vsel %vm552_vm3, %v550_v60, %v546_v2  ;;  %v1102_v1 = vld [vmem:[#allocation8 + $0x28] sm:$0xff]   ;;  %v1103_v2 = vld [vmem:[#allocation8 + $0x30] sm:$0xff]  }
 0x137   :  { %vm553_vm5 = vcmp.gt.f32.partialorder %v551_v3, %v547_v6  ;;  %v564_v58 = vmax.f32 %v538_v55, 0.0  ;;  %v565_v60 = vmax.f32 %v539_v57, 0.0  ;;  %1015 = vmatpush3.bf16.msra.mxu0 %v1102_v1 }
 0x138   :  { %v557_v8 = vsel %vm553_vm5, %v401_v0, %v549_v5  ;;  %v555_v9 = vsel %vm553_vm5, %v551_v3, %v547_v6  ;;  %1016 = vmatprep.subr.bf16.mxu0 %v1248_v35  ;;  %v1104_v3 = vld [vmem:[#allocation8 + $0x38] sm:$0xff]  }
 0x13b   :  { %1017 = vmatpush3.bf16.msra.mxu0 %v1103_v2 }
 0x13c   :  { %1018 = vmatprep.subr.bf16.mxu0 %v1248_v35 }
 0x13f   :  { %v438_v10 = vpop.f32.mrb[4].mxu0  ;;  %1019 = vmatpush3.bf16.msra.mxu0 %v1104_v3 }
 0x140   :  { %v558_v11 = vand.u32 2147483647, %v438_v10  ;;  %v440_v12 = vpop.f32.mrb[5].mxu0 }
 0x141   :  { %v693_v13 = vand.u32 2147483647, %v440_v12  ;;  %v481_v14 = vpop.f32.mrb[4].mxu1  ;;  %v442_v15 = vpop.f32.mrb[6].mxu0 }
 0x142   :  { %vm560_vm6 = vcmp.gt.f32.partialorder %v558_v11, %v554_v7  ;;  %v695_v16 = vand.u32 2147483647, %v481_v14  ;;  %v559_v17 = vand.u32 2147483647, %v442_v15  ;;  %v483_v18 = vpop.f32.mrb[5].mxu1  ;;  %v444_v19 = vpop.f32.mrb[7].mxu0 }
 0x143   :  { %v562_v20 = vsel %vm560_vm6, %v438_v10, %v556_v4  ;;  %v703_v21 = vand.u32 2147483647, %v483_v18  ;;  %v694_v22 = vand.u32 2147483647, %v444_v19  ;;  %v485_v23 = vpop.f32.mrb[6].mxu1 }
 0x144   :  { %v918_v24 = vmul.f32 -1.442695, %v562_v20  ;;  %vm697_vm7 = vcmp.gt.f32.partialorder %v695_v16, %v693_v13  ;;  %vm561_vm8 = vcmp.gt.f32.partialorder %v559_v17, %v555_v9  ;;  %v696_v25 = vand.u32 2147483647, %v485_v23  ;;  %v487_v26 = vpop.f32.mrb[7].mxu1 }
 0x145   :  { %v701_v27 = vsel %vm697_vm7, %v481_v14, %v440_v12  ;;  %v563_v28 = vsel %vm561_vm8, %v442_v15, %v557_v8  ;;  %v699_v29 = vsel %vm697_vm7, %v695_v16, %v693_v13  ;;  %v704_v30 = vand.u32 2147483647, %v487_v26  ;;  %v920_v8 = vld [vmem:[%s1429_s4] ss:$0 sm:$0xff]  ;;  %s1250_s4 = smov [#allocation10]  }
 0x146   :  { %1105 = vpow2.f32 %v918_v24  ;;  %v919_v31 = vmul.f32 -1.442695, %v563_v28  ;;  %vm705_vm9 = vcmp.gt.f32.partialorder %v703_v21, %v699_v29  ;;  %vm698_vm10 = vcmp.gt.f32.partialorder %v696_v25, %v694_v22  ;;  %s861_s9 = sshll.u32 %s1250_s4, 4  ;;  %s862_s9 = int_to_ptr.vmem [resolvable:$true] %s861_s9 }
 0x147   :  { %v709_v32 = vsel %vm705_vm9, %v483_v18, %v701_v27  ;;  %v702_v33 = vsel %vm698_vm10, %v485_v23, %v444_v19  ;;  %v700_v34 = vsel %vm698_vm10, %v696_v25, %v694_v22  ;;  %v707_v36 = vsel %vm705_vm9, %v703_v21, %v699_v29  ;;  %v931_v21 = vld [vmem:[%s1431_s6] ss:$0 sm:$0xff]  ;;  %s1209_s10 = scalar_lea.vmem %s862_s9, 128  ;;  %p1214_p5 = scmp.lt.s32.totalorder %s862_s9, %s862_s9 }
 0x148   :  { %1107 = vpow2.f32 %v919_v31  ;;  %vm706_vm11 = vcmp.gt.f32.partialorder %v704_v30, %v700_v34  ;;  %p1210_p4 = scmp.ne.s32.totalorder %s862_s9, %s1209_s10  ;;  %p1215_p6 = scmp.lt.s32.totalorder %s1209_s10, %s1209_s10 }
 0x149   :  { %v710_v37 = vsel %vm706_vm11, %v487_v26, %v702_v33  ;;  %v708_v38 = vsel %vm706_vm11, %v704_v30, %v700_v34 }
 0x14a   :  { %p1216_p7 = por %p1215_p6, %p1214_p5 }
 0x14c   :  { %p1217_p8 = pnand %p1216_p7, %p1210_p4 }
 0x14f   :  { %v524_v39 = vpop.f32.mrb[8].mxu0 }
 0x150   :  { %v1106_v40 = vpop.eup %1105  ;;  %v711_v41 = vand.u32 2147483647, %v524_v39  ;;  %v982_v42 = vpop.f32.mrb[9].mxu0 }
 0x151   :  { %v572_v43 = vadd.f32 1.0, %v1106_v40  ;;  %v527_v44 = vpop.f32.mrb[10].mxu0 }
 0x152   :  { %v1108_v45 = vpop.eup %1107  ;;  %vm1385_vm12 = vcmp.gt.f32.partialorder %v711_v41, %v707_v36  ;;  %v712_v47 = vand.u32 2147483647, %v527_v44  ;;  %v983_v48 = vpop.f32.mrb[11].mxu0 }
 0x153   :  { %1109 = vrcp.f32 %v572_v43  ;;  %v573_v49 = vadd.f32 1.0, %v1108_v45  ;;  %v715_v50 = vsel %vm1385_vm12, %v524_v39, %v709_v32 }
 0x154   :  { %vm1391_vm13 = vcmp.gt.f32.partialorder %v712_v47, %v708_v38  ;;  %v929_v52 = vmul.f32 -1.442695, %v715_v50 }
 0x155   :  { %1111 = vrcp.f32 %v573_v49  ;;  %v716_v54 = vsel %vm1391_vm13, %v527_v44, %v710_v37 }
 0x156   :  { %v930_v56 = vmul.f32 -1.442695, %v716_v54  ;;  %1113 = vpow2.f32 %v929_v52 }
 0x158   :  { %1115 = vpow2.f32 %v930_v56 }
 0x15d   :  { %v1110_v59 = vpop.eup %1109 }
 0x15e   :  { %v578_v61 = vmul.f32 %v1110_v59, %v564_v58 }
 0x15f   :  { %v1112_v62 = vpop.eup %1111 }
 0x160   :  { %v579_v63 = vmul.f32 %v1112_v62, %v565_v60  ;;  %v1114_v4 = vpop.eup %1113 }
 0x161   :  { %v725_v6 = vadd.f32 1.0, %v1114_v4 }
 0x162   :  { %v580_v0 = vpack.c.bf16 %v579_v63, %v578_v61  ;;  %v1116_v5 = vpop.eup %1115 }
 0x163   :  { %v726_v7 = vadd.f32 1.0, %v1116_v5  ;;  %1117 = vrcp.f32 %v725_v6 }
 0x164   :  { %1001 = vmatmul.mubr.bf16.vlgmr.msra.gmra.mrb[8].mxu1 %v580_v0 }
 0x165   :  { %1119 = vrcp.f32 %v726_v7 }
 0x16d   :  { %v1118_v15 = vpop.eup %1117 }
 0x16f   :  { %v1120_v18 = vpop.eup %1119 }
 0x237   :  { %v686_v9 = vpop.f32.mrb[8].mxu1 }
 0x238   :  { %v687_v10 = vadd.f32 %v920_v8, %v686_v9  ;;  %v1002_v11 = vpop.f32.mrb[9].mxu1 }
 0x239   :  { %v689_v35 = vpop.f32.mrb[10].mxu1 }
 0x23a   :  { %v717_v12 = vmax.f32 %v687_v10, 0.0  ;;  %v690_v13 = vadd.f32 %v920_v8, %v689_v35  ;;  %v1003_v14 = vpop.f32.mrb[11].mxu1 }
 0x23c   :  { %v731_v16 = vmul.f32 %v1118_v15, %v717_v12  ;;  %v718_v17 = vmax.f32 %v690_v13, 0.0 }
 0x23e   :  { %v732_v19 = vmul.f32 %v1120_v18, %v718_v17 }
 0x240   :  { %v733_v20 = vpack.c.bf16 %v732_v19, %v731_v16 }
 0x242   :  { %1021 = vmatmul.mubr.bf16.vlgmr.msra.gmra.mrb[12].mxu0 %v733_v20 }
 0x315   :  { %v839_v22 = vpop.f32.mrb[12].mxu0 }
 0x316   :  { %v1022_v23 = vpop.f32.mrb[13].mxu0  ;;  %v840_v25 = vadd.f32 %v931_v21, %v839_v22 }
 0x317   :  { %v842_v24 = vpop.f32.mrb[14].mxu0 }
 0x318   :  { %v843_v26 = vadd.f32 %v931_v21, %v842_v24  ;;  %v1023_v27 = vpop.f32.mrb[15].mxu0 }
 0x31a   :  { %v947_v28 = vpack.c.bf16 %v843_v26, %v840_v25 }
 0x31c   :  { %948 = vst [vmem:[#allocation10] sm:$0xff] %v947_v28  }
 0x31d   :  { %1220 = shalt.err (!%p1217_p8)
}
 0x31e   :  { %s1221_s12 = scalar_lea.hbm %s1432_s7, 128 }
 0x31f   :  { %p1222_p9 = scmp.ne.s32.totalorder %s1432_s7, %s1221_s12  ;;  %p1225_p10 = scmp.lt.u32.totalorder %s1221_s12, %s1432_s7 }
 0x321   :  { %p1227_p11 = pnand %p1225_p10, %p1222_p9 }
 0x323   :  { %1230 = shalt.err (!%p1227_p11)
}
 0x324   :  { %867 = dma.vmem_to_hbm [thread:$0]  %s862_s9, 128, %s1432_s7, [#allocation4], %s1243_s1, %s1243_s1, %s1244_s25  }
 0x325   :  { %1237 = dma.done.wait [#allocation4], 128  }
 0x326   :  { %1238 = vsyncadd [#allocation4], 4294967168 }
 0x327   :  { %871 = vsyncpa [#allocation3], 1 }
 0x328   :  { %872 = vsyncpa [#allocation6], 1 }
 0x329   :  { %873 = vsyncpa [#allocation9], 1 }
 0x32a   :  { %874 = vsyncpa [#allocation4], 1 }

</bundles_post_ra>
